<compile_context>
chip_gen: v5e
topology: v5e:2x2
jax: 0.10.0
libtpu: 0.0.40
codegen_flags: <defaults>
</compile_context>

<pallas_src>
import math
import functools

import jax
import jax.numpy as jnp
from jax.experimental import pallas as pl
from jax.experimental.pallas import tpu as pltpu


def make_pos_embedding(emb_size: int, maxlen: int = 200) -> jnp.ndarray:
    """Deterministic buffer init, matching the PyTorch __init__ math."""
    den = jnp.exp(
        -jnp.arange(0, emb_size, 2, dtype=jnp.float32) * (math.log(10000.0) / emb_size)
    )
    pos = jnp.arange(0, maxlen, dtype=jnp.float32).reshape(maxlen, 1)
    pe = jnp.zeros((maxlen, emb_size), dtype=jnp.float32)
    pe = pe.at[:, 0::2].set(jnp.sin(pos * den))
    pe = pe.at[:, 1::2].set(jnp.cos(pos * den))
    return pe[:, None, :]  # (maxlen, 1, emb_size)


# --------------------------------------------------------------------------
# Kernels
# --------------------------------------------------------------------------

def _posenc_eval_kernel(tok_ref, pos_ref, out_ref):
    # tok_ref: (ts, B, E) tile; pos_ref: (S, 1, E) fully resident.
    ts = tok_ref.shape[0]
    start = pl.multiple_of(pl.program_id(0) * ts, ts)
    pos = pos_ref[pl.ds(start, ts)]                       # (ts, 1, E)
    out_ref[...] = (tok_ref[...] + pos).astype(out_ref.dtype)


def _posenc_train_kernel(seed_ref, tok_ref, pos_ref, out_ref, *,
                         keep_thresh: int, scale: float):
    ts, B, E = tok_ref.shape
    start = pl.multiple_of(pl.program_id(0) * ts, ts)
    x = tok_ref[...] + pos_ref[pl.ds(start, ts)]          # (ts, B, E)

    # Counter-based PRNG: hash of the absolute element index (tile-independent)
    # mixed with the seed, generated directly in the block shape (no reshape).
    rows = jax.lax.broadcasted_iota(jnp.int32, (ts, B, E), 0) + start
    bcol = jax.lax.broadcasted_iota(jnp.int32, (ts, B, E), 1)
    ecol = jax.lax.broadcasted_iota(jnp.int32, (ts, B, E), 2)
    idx = (rows * B + bcol) * E + ecol                    # global linear index

    seed_u = seed_ref[0].astype(jnp.uint32) * jnp.uint32(0x9E3779B9)
    h = idx.astype(jnp.uint32) ^ seed_u
    # splitmix32-style finalizer: uniform over uint32.
    h = h ^ (h >> 16)
    h = h * jnp.uint32(0x7FEB352D)
    h = h ^ (h >> 15)
    h = h * jnp.uint32(0x846CA68B)
    h = h ^ (h >> 16)

    # Integer-domain compare: P(keep) = 1 - p exactly (to 2^-32).
    keep = h >= jnp.uint32(keep_thresh)
    scaled = x * jnp.asarray(scale, dtype=x.dtype)
    out_ref[...] = jnp.where(keep, scaled, jnp.zeros((), x.dtype)).astype(out_ref.dtype)


# --------------------------------------------------------------------------
# Wrapper
# --------------------------------------------------------------------------

def _pick_seq_tile(seq_len: int, row_bytes: int, target_bytes: int) -> int:
    """Largest divisor of seq_len whose block fits in ~target_bytes."""
    if seq_len * row_bytes <= target_bytes:
        return seq_len
    best = 1
    for d in range(1, seq_len + 1):
        if seq_len % d == 0 and d * row_bytes <= target_bytes:
            best = d
    return best


def positional_encoding(
    token_embedding: jnp.ndarray,   # (S, B, E)
    pos_embedding: jnp.ndarray,     # (maxlen, 1, E)
    *,
    dropout_p: float = 0.0,
    training: bool = False,
    seed: int = 0,
    target_block_bytes: int = 2 * 1024 * 1024,   # ~2 MiB token block (v5e/v6e/v7x safe)
):
    S, B, E = token_embedding.shape
    maxlen = pos_embedding.shape[0]
    assert S <= maxlen, "sequence length exceeds maxlen of positional buffer"

    # Pre-slice + pre-cast the positional buffer; kept fully resident in VMEM.
    pos = pos_embedding[:S].astype(token_embedding.dtype)     # (S, 1, E)

    # TODO(synk): for very small batch the (B, E) minor dims pad to 8 sublanes /
    # 128 lanes; a lane-dense (S, B*E) presentation would be tighter but needs
    # an in-kernel pos broadcast along lanes — not done here.
    row_bytes = B * E * token_embedding.dtype.itemsize
    ts = _pick_seq_tile(S, row_bytes, target_block_bytes)
    grid = (S // ts,)

    out_shape = jax.ShapeDtypeStruct((S, B, E), token_embedding.dtype)
    compiler_params = pltpu.CompilerParams(
        dimension_semantics=("parallel",),          # grid steps fully independent
        vmem_limit_bytes=32 * 1024 * 1024,          # headroom for double-buffered blocks
    )

    if training and dropout_p > 0.0:
        p = float(dropout_p)
        keep_thresh = min(max(int(round(p * 4294967296.0)), 0), 4294967295)
        kernel = functools.partial(
            _posenc_train_kernel, keep_thresh=keep_thresh, scale=1.0 / (1.0 - p)
        )
        grid_spec = pltpu.PrefetchScalarGridSpec(
            num_scalar_prefetch=1,
            grid=grid,
            in_specs=[
                pl.BlockSpec((ts, B, E), lambda i, seed_ref: (i, 0, 0)),
                pl.BlockSpec((S, 1, E), lambda i, seed_ref: (0, 0, 0)),  # resident
            ],
            out_specs=pl.BlockSpec((ts, B, E), lambda i, seed_ref: (i, 0, 0)),
        )
        seed_arr = jnp.array([seed], dtype=jnp.int32)
        return pl.pallas_call(
            kernel,
            out_shape=out_shape,
            grid_spec=grid_spec,
            compiler_params=compiler_params,
        )(seed_arr, token_embedding, pos)

    # Eval mode (dropout == identity): pure broadcast add.
    grid_spec = pltpu.PrefetchScalarGridSpec(
        num_scalar_prefetch=0,
        grid=grid,
        in_specs=[
            pl.BlockSpec((ts, B, E), lambda i: (i, 0, 0)),
            pl.BlockSpec((S, 1, E), lambda i: (0, 0, 0)),   # resident
        ],
        out_specs=pl.BlockSpec((ts, B, E), lambda i: (i, 0, 0)),
    )
    return pl.pallas_call(
        _posenc_eval_kernel,
        out_shape=out_shape,
        grid_spec=grid_spec,
        compiler_params=compiler_params,
    )(token_embedding, pos)


# --------------------------------------------------------------------------
# Demo / self-test
# --------------------------------------------------------------------------

if __name__ == "__main__":
    # Small shapes consistent with the module: seq=8, batch=2, emb_size=32.
    S, B, E = 8, 2, 32
    maxlen = 200
    dropout_p = 0.1

    key = jax.random.PRNGKey(0)
    token_embedding = jax.random.normal(key, (S, B, E), dtype=jnp.float32)
    pos_embedding = make_pos_embedding(E, maxlen)

    ref = token_embedding + pos_embedding[:S]

    # --- Eval mode (dropout == identity): exact semantics, single block. ---
    out_eval = positional_encoding(
        token_embedding, pos_embedding, dropout_p=dropout_p, training=False
    )
    out_eval = jax.block_until_ready(out_eval)
    assert out_eval.shape == (S, B, E)
    assert jnp.allclose(out_eval, ref, atol=1e-6, rtol=1e-6)

    # Also exercise the multi-tile grid path (forced tiny blocks) and check it
    # agrees with the single-block result.
    out_eval_tiled = jax.block_until_ready(
        positional_encoding(
            token_embedding, pos_embedding, dropout_p=dropout_p, training=False,
            target_block_bytes=512,
        )
    )
    assert jnp.allclose(out_eval_tiled, ref, atol=1e-6, rtol=1e-6)

    # --- Training mode: in-kernel counter-based dropout. ---
    # TODO(synk): torch's dropout RNG stream cannot be reproduced bitwise; the
    # kernel matches the distribution (inverted dropout, keep-prob 1-p).
    out_train = jax.block_until_ready(
        positional_encoding(
            token_embedding, pos_embedding, dropout_p=dropout_p, training=True, seed=0
        )
    )
    assert out_train.shape == (S, B, E)

    # Every element is either 0 (dropped) or (token+pos)/(1-p) (kept).
    scale = 1.0 / (1.0 - dropout_p)
    is_zero = jnp.abs(out_train) < 1e-6
    is_scaled = jnp.abs(out_train - ref * scale) < 1e-4
    assert bool(jnp.all(is_zero | is_scaled))

    # Drop fraction is sane (loose bound; N = 512 elements, p = 0.1).
    n_dropped = int(jnp.sum(is_zero & ~is_scaled))
    assert 0 < n_dropped < int(0.4 * S * B * E)

    # Mask is tiling-independent: tiled run reproduces the same output.
    out_train_tiled = jax.block_until_ready(
        positional_encoding(
            token_embedding, pos_embedding, dropout_p=dropout_p, training=True, seed=0,
            target_block_bytes=512,
        )
    )
    assert jnp.allclose(out_train_tiled, out_train, atol=1e-6, rtol=1e-6)

    print("KERNEL_OK")
</pallas_src>

<mosaic_0001>
module attributes {stable_mosaic.version = 11 : i64} {
  func.func @_posenc_eval_kernel(%arg0: i32, %arg1: memref<8x2x32xf32, #tpu.memory_space<vmem>>, %arg2: memref<8x1x32xf32, #tpu.memory_space<vmem>>, %arg3: memref<8x2x32xf32, #tpu.memory_space<vmem>>) attributes {dimension_semantics = [#tpu.dimension_semantics<parallel>], iteration_bounds = array<i64: 1>, scalar_prefetch = 0 : i64, scratch_operands = 0 : i64, tpu.core_type = #tpu.core_type<tc>, window_params = [{transform_indices = @transform_0, window_bounds = array<i64: 8, 2, 32>}, {pipeline_mode = #tpu.pipeline_mode<synchronous>, transform_indices = @transform_1, window_bounds = array<i64: 8, 1, 32>}, {transform_indices = @transform_2, window_bounds = array<i64: 8, 2, 32>}]} {
    %c8_i32 = arith.constant 8 : i32
    %0 = arith.muli %arg0, %c8_i32 : i32
    %1 = tpu.assume_multiple %0, 8 : i32
    %2 = arith.index_cast %1 : i32 to index
    %c0 = arith.constant 0 : index
    %c0_0 = arith.constant 0 : index
    %3 = vector.load %arg2[%2, %c0, %c0_0] : memref<8x1x32xf32, #tpu.memory_space<vmem>>, vector<8x1x32xf32>
    %c0_1 = arith.constant 0 : index
    %c0_2 = arith.constant 0 : index
    %c0_3 = arith.constant 0 : index
    %4 = vector.load %arg1[%c0_1, %c0_2, %c0_3] : memref<8x2x32xf32, #tpu.memory_space<vmem>>, vector<8x2x32xf32>
    %5 = vector.broadcast %3 : vector<8x1x32xf32> to vector<8x2x32xf32>
    %6 = arith.addf %4, %5 : vector<8x2x32xf32>
    %c0_4 = arith.constant 0 : index
    %c0_5 = arith.constant 0 : index
    %c0_6 = arith.constant 0 : index
    %7 = vector.load %arg3[%c0_4, %c0_5, %c0_6] : memref<8x2x32xf32, #tpu.memory_space<vmem>>, vector<8x2x32xf32>
    tpu.vector_store %arg3[%c0_4, %c0_5, %c0_6], %6 {strides = array<i32>} : memref<8x2x32xf32, #tpu.memory_space<vmem>>, vector<8x2x32xf32>,
    return
  }
  func.func @transform_0(%arg0: i32) -> (i32, i32, i32) {
    %c0_i32 = arith.constant 0 : i32
    %c0_i32_0 = arith.constant 0 : i32
    %c0_i32_1 = arith.constant 0 : i32
    return %arg0, %c0_i32, %c0_i32_0 : i32, i32, i32
  }
  func.func @transform_1(%arg0: i32) -> (i32, i32, i32) {
    %c0_i32 = arith.constant 0 : i32
    %c0_i32_0 = arith.constant 0 : i32
    %c0_i32_1 = arith.constant 0 : i32
    %c0_i32_2 = arith.constant 0 : i32
    return %c0_i32, %c0_i32_0, %c0_i32_1 : i32, i32, i32
  }
  func.func @transform_2(%arg0: i32) -> (i32, i32, i32) {
    %c0_i32 = arith.constant 0 : i32
    %c0_i32_0 = arith.constant 0 : i32
    %c0_i32_1 = arith.constant 0 : i32
    return %arg0, %c0_i32, %c0_i32_0 : i32, i32, i32
  }
}

</mosaic_0001>

<bundles_post_ra>
// kernel: tpu_custom_call.1
= control target key start
LH: loop header
LB: loop body
LE: loop exit
PB: predicated region body
PF: predicated region fallthrough
CT: control target
= control target key end

     0   :  { %7 = vsyncpa [#allocation3], 0  ;;  %s268_s0 = inlined_call_operand.hbm [shape: f32[8,2,32], index: 0, kind: input, shape index: {}]   ;;  %s269_s1 = inlined_call_operand.hbm [shape: f32[8,1,32], index: 1, kind: input, shape index: {}]   ;;  %s270_s2 = inlined_call_operand.hbm [shape: f32[8,2,32], index: 2, kind: output, shape index: {}]  }
   0x1   :  { %8 = vsyncpa [#allocation6], 0 }
   0x2   :  { %9 = vsyncpa [#allocation4], 0  ;;  %s14_s11 = sshll.u32 %s268_s0, 4  ;;  %s216_s12 = smov [#allocation2]   ;;  %s15_s11 = int_to_ptr.hbm [resolvable:$true] %s14_s11 }
   0x3   :  { %s16_s13 = sshll.u32 %s216_s12, 4  ;;  %s27_s16 = sshll.u32 %s269_s1, 4  ;;  %s17_s13 = int_to_ptr.vmem [resolvable:$true] %s16_s13  ;;  %s28_s16 = int_to_ptr.hbm [resolvable:$true] %s27_s16 }
   0x4   :  { %s217_s17 = smov 32   ;;  %s218_s18 = smov 2  }
   0x5   :  { %22 = dma.hbm_to_vmem [thread:$0]  %s15_s11, 256, %s17_s13, [#allocation3], %s217_s17, %s217_s17, %s218_s18  }
   0x6   :  { %s219_s19 = smov [#allocation5]   ;;  %s220_s21 = smov 16  }
   0x7   :  { %s29_s20 = sshll.u32 %s219_s19, 4  ;;  %s221_s0 = smov 1   ;;  %s30_s20 = int_to_ptr.vmem [resolvable:$true] %s29_s20 }
   0x8   :  { %35 = dma.hbm_to_vmem [thread:$0]  %s28_s16, 128, %s30_s20, [#allocation6], %s220_s21, %s220_s21, %s221_s0  }
   0x9   :  { %210 = dma.done.wait [#allocation3], 256  }
   0xa   :  { %211 = vsyncadd [#allocation3], 4294967040 }
   0xb   :  { %212 = dma.done.wait [#allocation6], 128  }
   0xc   :  { %213 = vsyncadd [#allocation6], 4294967168  ;;  %vm94_vm0 = vcmask 254976   ;;  %s222_s22 = smov [#allocation7]   ;;  %s109_s25 = sshll.u32 %s270_s2, 4  ;;  %s110_s25 = int_to_ptr.hbm [resolvable:$true] %s109_s25 }
   0xd   :  { %s247_s1 = sshll.u32 %s222_s22, 4  ;;  %v54_v0 = vld [vmem:[#allocation2] sm:$0x3]  ;;  %v130_v1 = vld [vmem:[#allocation5] ss:$0 sm:$0xff]  ;;  %s108_s1 = int_to_ptr.vmem [resolvable:$true] %s247_s1 }
   0xe   :  { %v55_v2 = vld [vmem:[#allocation2 + $0x2] sm:$0x3]  ;;  %v131_v3 = vld [vmem:[#allocation5 + $0x1] ss:$0 sm:$0xff]  ;;  %v86_v4 = vadd.f32 %v130_v1, %v54_v0  ;;  %v56_v5 = vld [vmem:[#allocation2 + $0x4] sm:$0x3] }
   0xf   :  { %v132_v6 = vld [vmem:[#allocation5 + $0x2] ss:$0 sm:$0xff]  ;;  %v87_v7 = vadd.f32 %v131_v3, %v55_v2  ;;  %v57_v8 = vld [vmem:[#allocation2 + $0x6] sm:$0x3]  ;;  %v133_v9 = vld [vmem:[#allocation5 + $0x3] ss:$0 sm:$0xff] }
  0x10   :  { %95 = vst.msk [vmem:[#allocation7] sm:$0x3] %vm94_vm0, %v86_v4  ;;  %v88_v10 = vadd.f32 %v132_v6, %v56_v5  ;;  %v58_v11 = vld [vmem:[#allocation2 + $0x8] sm:$0x3]  ;;  %v89_v12 = vadd.f32 %v133_v9, %v57_v8  ;;  %v134_v13 = vld [vmem:[#allocation5 + $0x4] ss:$0 sm:$0xff] }
  0x11   :  { %96 = vst.msk [vmem:[#allocation7 + $0x2] sm:$0x3] %vm94_vm0, %v87_v7  ;;  %v59_v14 = vld [vmem:[#allocation2 + $0xa] sm:$0x3]  ;;  %v135_v15 = vld [vmem:[#allocation5 + $0x5] ss:$0 sm:$0xff]  ;;  %v90_v16 = vadd.f32 %v134_v13, %v58_v11 }
  0x12   :  { %97 = vst.msk [vmem:[#allocation7 + $0x4] sm:$0x3] %vm94_vm0, %v88_v10  ;;  %v60_v17 = vld [vmem:[#allocation2 + $0xc] sm:$0x3]  ;;  %v91_v18 = vadd.f32 %v135_v15, %v59_v14  ;;  %v136_v19 = vld [vmem:[#allocation5 + $0x6] ss:$0 sm:$0xff] }
  0x13   :  { %98 = vst.msk [vmem:[#allocation7 + $0x6] sm:$0x3] %vm94_vm0, %v89_v12  ;;  %v61_v20 = vld [vmem:[#allocation2 + $0xe] sm:$0x3]  ;;  %v137_v21 = vld [vmem:[#allocation5 + $0x7] ss:$0 sm:$0xff]  ;;  %v92_v22 = vadd.f32 %v136_v19, %v60_v17 }
  0x14   :  { %99 = vst.msk [vmem:[#allocation7 + $0x8] sm:$0x3] %vm94_vm0, %v90_v16  ;;  %v93_v23 = vadd.f32 %v137_v21, %v61_v20 }
  0x15   :  { %100 = vst.msk [vmem:[#allocation7 + $0xa] sm:$0x3] %vm94_vm0, %v91_v18 }
  0x16   :  { %101 = vst.msk [vmem:[#allocation7 + $0xc] sm:$0x3] %vm94_vm0, %v92_v22 }
  0x17   :  { %102 = vst.msk [vmem:[#allocation7 + $0xe] sm:$0x3] %vm94_vm0, %v93_v23 }
  0x18   :  { %115 = dma.vmem_to_hbm [thread:$0]  %s108_s1, 256, %s110_s25, [#allocation4], %s217_s17, %s217_s17, %s218_s18  }
  0x19   :  { %214 = dma.done.wait [#allocation4], 256  }
  0x1a   :  { %215 = vsyncadd [#allocation4], 4294967040 }
  0x1b   :  { %120 = vsyncpa [#allocation3], 1 }
  0x1c   :  { %121 = vsyncpa [#allocation6], 1 }
  0x1d   :  { %122 = vsyncpa [#allocation4], 1 }

</bundles_post_ra>
